<compile_context>
chip_gen: v7x
topology: tpu7x:2x2x1
jax: 0.10.0
libtpu: 0.0.40
codegen_flags: <defaults>
</compile_context>

<pallas_src>
import numpy as np
import jax
import jax.numpy as jnp
from jax.experimental import pallas as pl
from jax.experimental.pallas import tpu as pltpu


def _round_up(x, m):
    return (x + m - 1) // m * m


def _linear_kernel(x_ref, w_ref, b_ref, o_ref):
    # x_ref: [tm, H]   activations tile
    # w_ref: [H, tn]   pre-transposed, lane-dense weight tile
    # b_ref: [1, tn]   bias tile (f32)
    # o_ref: [tm, tn]  logits tile
    acc = jnp.dot(x_ref[...], w_ref[...], preferred_element_type=jnp.float32)
    o_ref[...] = (acc + b_ref[...]).astype(o_ref.dtype)


def prepare_generator_params(weight, bias, *, compute_dtype=None):
    """One-time parameter relayout — call at init, NOT per forward.

    weight: [V, H] (PyTorch nn.Linear layout) -> [H, Vp] lane-dense, V padded to 128
    bias:   [V]                               -> [1, Vp] float32
    Returns (w_t, b2, V).
    """
    V, H = weight.shape
    Vp = _round_up(V, 128)
    w_t = weight.T                                   # [H, V]
    if compute_dtype is not None:
        w_t = w_t.astype(compute_dtype)
    b2 = bias.astype(jnp.float32).reshape(1, V)
    if Vp != V:
        w_t = jnp.pad(w_t, ((0, 0), (0, Vp - V)))
        b2 = jnp.pad(b2, ((0, 0), (0, Vp - V)))
    return w_t, b2, V


def _pick_tile_n(Vp, target):
    """Largest multiple of 128 that divides Vp and is <= target."""
    q = Vp // 128
    d_max = max(1, min(q, target // 128))
    for d in range(d_max, 0, -1):
        if q % d == 0:
            return 128 * d
    return 128


def generator_forward(x, w_t, b2, vocab_size, *, out_dtype=None,
                      compute_dtype=None, tile_m=256, tile_n=None,
                      vmem_cap_bytes=48 << 20):
    """Vocab-logit projection: x @ W.T + b, with pre-relaid-out params.

    x:          [..., H]  activations (channels-last, like PyTorch [B, T, C])
    w_t:        [H, Vp]   from prepare_generator_params
    b2:         [1, Vp]   f32 bias, from prepare_generator_params
    vocab_size: true V (un-padded)
    out_dtype:  logits dtype (default: x.dtype; bf16 halves the output stream)
    compute_dtype: optional cast of activations for the MXU (weight should have
                   been prepared with the same dtype); accumulation stays f32.
    """
    orig_shape = x.shape
    H = orig_shape[-1]
    Hw, Vp = w_t.shape
    if Hw != H:
        raise ValueError(f"weight hidden dim {Hw} != activation hidden dim {H}")
    M = int(np.prod(orig_shape[:-1]))
    if out_dtype is None:
        out_dtype = x.dtype
    if compute_dtype is not None:
        x = x.astype(compute_dtype)

    x2 = x.reshape(M, H)

    x_bytes = jnp.dtype(x2.dtype).itemsize
    w_bytes = jnp.dtype(w_t.dtype).itemsize
    out_bytes = jnp.dtype(out_dtype).itemsize

    # Row alignment: 16-row sublane multiple when any 16-bit operand is present.
    sub = 16 if min(x_bytes, w_bytes, out_bytes) < 4 else 8
    Mp = _round_up(M, sub)
    tm = min(tile_m, Mp)
    tm = _round_up(tm, sub)
    Mp = _round_up(Mp, tm)
    if Mp != M:
        x2 = jnp.pad(x2, ((0, Mp - M), (0, 0)))   # small per-call pad (acts only)

    # Vocab tile: big for decode-sized M (fewer grid steps, bigger weight DMAs),
    # shrunk until the (lane-padded) VMEM estimate fits the v7x 64 MiB budget.
    if tile_n is None:
        tile_n = 8192 if out_bytes <= 2 else 4096
    tn = _pick_tile_n(Vp, min(tile_n, Vp))

    def vmem_est(tn_):
        # Double-buffered tiles; H<=128 pads to 128 lanes for x, 8 sublanes for w.
        return 2 * (tm * _round_up(H, 128) * x_bytes
                    + _round_up(H, 8) * tn_ * w_bytes
                    + 8 * tn_ * 4
                    + tm * tn_ * out_bytes)

    while tn > 128 and vmem_est(tn) > vmem_cap_bytes:
        tn = _pick_tile_n(Vp, tn // 2)

    vmem_limit = int(min(56 << 20, max(vmem_est(tn) + (4 << 20), 16 << 20)))

    # V outer / M inner: the weight tile's block index only depends on the outer
    # axis, so it is fetched once per V tile and reused across all M tiles.
    grid = (Vp // tn, Mp // tm)

    out = pl.pallas_call(
        _linear_kernel,
        out_shape=jax.ShapeDtypeStruct((Mp, Vp), out_dtype),
        grid=grid,
        in_specs=[
            pl.BlockSpec((tm, H), lambda j, i: (i, 0)),    # activations tile
            pl.BlockSpec((H, tn), lambda j, i: (0, j)),    # stationary weight tile
            pl.BlockSpec((1, tn), lambda j, i: (0, j)),    # bias slice
        ],
        out_specs=pl.BlockSpec((tm, tn), lambda j, i: (i, j)),
        compiler_params=pltpu.CompilerParams(
            dimension_semantics=("parallel", "parallel"),
            vmem_limit_bytes=vmem_limit),
    )(x2, w_t, b2)

    out = out[:M, :vocab_size]
    return out.reshape(*orig_shape[:-1], vocab_size)


if __name__ == "__main__":
    # Synthetic config consistent with the module:
    #   args.decoder_output_size = 32 (hidden), len(dictionary) = 64 (vocab)
    batch, seq, hidden, vocab = 2, 8, 32, 64

    key = jax.random.PRNGKey(0)
    kx, kw, kb = jax.random.split(key, 3)

    x = jax.random.normal(kx, (batch, seq, hidden), dtype=jnp.float32)
    # nn.Linear parameter shapes: W [vocab, hidden], b [vocab]
    weight = jax.random.normal(kw, (vocab, hidden), dtype=jnp.float32) * 0.02
    bias = jax.random.normal(kb, (vocab,), dtype=jnp.float32) * 0.02

    ref = x @ weight.T + bias

    # ---- f32 path (exact reference check) --------------------------------
    w_t32, b32, V = prepare_generator_params(weight, bias)
    out32 = jax.block_until_ready(generator_forward(x, w_t32, b32, V))
    assert out32.shape == (batch, seq, vocab)
    np.testing.assert_allclose(np.asarray(out32), np.asarray(ref),
                               rtol=1e-5, atol=1e-5)

    # ---- bf16 weight/activation stream + bf16 logits (bandwidth path) ----
    w_t16, b16, V = prepare_generator_params(weight, bias,
                                             compute_dtype=jnp.bfloat16)
    out16 = jax.block_until_ready(
        generator_forward(x, w_t16, b16, V,
                          compute_dtype=jnp.bfloat16, out_dtype=jnp.bfloat16))
    assert out16.shape == (batch, seq, vocab)
    np.testing.assert_allclose(np.asarray(out16, dtype=np.float32),
                               np.asarray(ref), rtol=5e-2, atol=2e-2)

    print("KERNEL_OK")
</pallas_src>

<mosaic_0001>
module attributes {stable_mosaic.version = 11 : i64} {
  func.func @_linear_kernel(%arg0: i32, %arg1: i32, %arg2: memref<16x32xf32, #tpu.memory_space<vmem>>, %arg3: memref<32x128xf32, #tpu.memory_space<vmem>>, %arg4: memref<1x128xf32, #tpu.memory_space<vmem>>, %arg5: memref<16x128xf32, #tpu.memory_space<vmem>>) attributes {dimension_semantics = [#tpu.dimension_semantics<parallel>, #tpu.dimension_semantics<parallel>], iteration_bounds = array<i64: 1, 1>, scalar_prefetch = 0 : i64, scratch_operands = 0 : i64, tpu.core_type = #tpu.core_type<tc>, window_params = [{transform_indices = @transform_0, window_bounds = array<i64: 16, 32>}, {transform_indices = @transform_1, window_bounds = array<i64: 32, 128>}, {transform_indices = @transform_2, window_bounds = array<i64: 1, 128>}, {transform_indices = @transform_3, window_bounds = array<i64: 16, 128>}]} {
    %c0 = arith.constant 0 : index
    %c0_0 = arith.constant 0 : index
    %0 = vector.load %arg2[%c0, %c0_0] : memref<16x32xf32, #tpu.memory_space<vmem>>, vector<16x32xf32>
    %c0_1 = arith.constant 0 : index
    %c0_2 = arith.constant 0 : index
    %1 = vector.load %arg3[%c0_1, %c0_2] : memref<32x128xf32, #tpu.memory_space<vmem>>, vector<32x128xf32>
    %cst = arith.constant dense<0.000000e+00> : vector<16x128xf32>
    %2 = tpu.matmul %0, %1, %cst {dimension_numbers = #tpu.dot_dimension_numbers<[1], [0], [0], [1], [0, 0, 1, 1], [], []>} : vector<16x32xf32>, vector<32x128xf32>, vector<16x128xf32> -> vector<16x128xf32>
    %c0_3 = arith.constant 0 : index
    %c0_4 = arith.constant 0 : index
    %3 = vector.load %arg4[%c0_3, %c0_4] : memref<1x128xf32, #tpu.memory_space<vmem>>, vector<1x128xf32>
    %4 = vector.broadcast %3 : vector<1x128xf32> to vector<16x128xf32>
    %5 = arith.addf %2, %4 : vector<16x128xf32>
    %c0_5 = arith.constant 0 : index
    %c0_6 = arith.constant 0 : index
    %6 = vector.load %arg5[%c0_5, %c0_6] : memref<16x128xf32, #tpu.memory_space<vmem>>, vector<16x128xf32>
    tpu.vector_store %arg5[%c0_5, %c0_6], %5 {strides = array<i32>} : memref<16x128xf32, #tpu.memory_space<vmem>>, vector<16x128xf32>,
    return
  }
  func.func @transform_0(%arg0: i32, %arg1: i32) -> (i32, i32) {
    %c0_i32 = arith.constant 0 : i32
    %c0_i32_0 = arith.constant 0 : i32
    return %arg1, %c0_i32 : i32, i32
  }
  func.func @transform_1(%arg0: i32, %arg1: i32) -> (i32, i32) {
    %c0_i32 = arith.constant 0 : i32
    %c0_i32_0 = arith.constant 0 : i32
    return %c0_i32, %arg0 : i32, i32
  }
  func.func @transform_2(%arg0: i32, %arg1: i32) -> (i32, i32) {
    %c0_i32 = arith.constant 0 : i32
    %c0_i32_0 = arith.constant 0 : i32
    return %c0_i32, %arg0 : i32, i32
  }
  func.func @transform_3(%arg0: i32, %arg1: i32) -> (i32, i32) {
    %c0_i32 = arith.constant 0 : i32
    return %arg1, %arg0 : i32, i32
  }
}

</mosaic_0001>

<bundles_post_ra>
// kernel: tpu_custom_call.1
= control target key start
LH: loop header
LB: loop body
LE: loop exit
PB: predicated region body
PF: predicated region fallthrough
CT: control target
= control target key end

     0   :  { %8 = vsyncpa [#allocation3], 0  ;;  %s336_s0 = inlined_call_operand.hbm [shape: f32[16,32], index: 0, kind: input, shape index: {}]   ;;  %s337_s1 = inlined_call_operand.hbm [shape: f32[32,128], index: 1, kind: input, shape index: {}]   ;;  %s338_s2 = inlined_call_operand.vmem [shape: f32[1,128], index: 2, kind: input, shape index: {}]   ;;  %s339_s3 = inlined_call_operand.hbm [shape: f32[16,128], index: 3, kind: output, shape index: {}]  }
   0x1   :  { %9 = vsyncpa [#allocation6], 0 }
   0x2   :  { %10 = vsyncpa [#allocation4], 0  ;;  %s263_s12 = smov [#allocation2]   ;;  %s191_s16 = scalar_lea.hbm %s336_s0, 256 }
   0x3   :  { %s16_s13 = sshll.u32 %s263_s12, 4  ;;  %p192_p0 = scmp.ne.s32.totalorder %s336_s0, %s191_s16  ;;  %s17_s13 = int_to_ptr.vmem [resolvable:$true] %s16_s13 }
   0x4   :  { %p195_p1 = scmp.lt.u32.totalorder %s191_s16, %s336_s0 }
   0x6   :  { %p197_p2 = pnand %p195_p1, %p192_p0 }
   0x8   :  { %200 = shalt.err (!%p197_p2)
}
   0x9   :  { %s201_s21 = scalar_lea.vmem %s17_s13, 256  ;;  %p206_p4 = scmp.lt.s32.totalorder %s17_s13, %s17_s13 }
   0xa   :  { %p202_p3 = scmp.ne.s32.totalorder %s17_s13, %s201_s21  ;;  %p207_p5 = scmp.lt.s32.totalorder %s201_s21, %s201_s21 }
   0xc   :  { %p208_p6 = por %p207_p5, %p206_p4 }
   0xe   :  { %p209_p7 = pnand %p208_p6, %p202_p3 }
  0x10   :  { %212 = shalt.err (!%p209_p7)
}
  0x11   :  { %s264_s22 = smov 128   ;;  %s265_s23 = smov 8  }
  0x12   :  { %22 = dma.hbm_to_vmem [thread:$0]  %s336_s0, 256, %s17_s13, [#allocation3], %s264_s22, %s264_s22, %s265_s23  }
  0x13   :  { %s266_s26 = smov [#allocation5]   ;;  %s213_s30 = scalar_lea.hbm %s337_s1, 512 }
  0x14   :  { %s28_s27 = sshll.u32 %s266_s26, 4  ;;  %p214_p8 = scmp.ne.s32.totalorder %s337_s1, %s213_s30  ;;  %s29_s27 = int_to_ptr.vmem [resolvable:$true] %s28_s27 }
  0x15   :  { %p217_p9 = scmp.lt.u32.totalorder %s213_s30, %s337_s1 }
  0x17   :  { %p219_p10 = pnand %p217_p9, %p214_p8 }
  0x19   :  { %222 = shalt.err (!%p219_p10)
}
  0x1a   :  { %s223_s8 = scalar_lea.vmem %s29_s27, 512  ;;  %p228_p12 = scmp.lt.s32.totalorder %s29_s27, %s29_s27 }
  0x1b   :  { %p224_p11 = scmp.ne.s32.totalorder %s29_s27, %s223_s8  ;;  %p229_p13 = scmp.lt.s32.totalorder %s223_s8, %s223_s8 }
  0x1d   :  { %p230_p0 = por %p229_p13, %p228_p12 }
  0x1f   :  { %p231_p1 = pnand %p230_p0, %p224_p11 }
  0x21   :  { %234 = shalt.err (!%p231_p1)
}
  0x22   :  { %34 = dma.hbm_to_vmem [thread:$0]  %s337_s1, 512, %s29_s27, [#allocation6], %s264_s22, %s264_s22, %s265_s23  }
  0x23   :  { %257 = dma.done.wait [#allocation3], 256  }
  0x24   :  { %258 = vsyncadd [#allocation3], 4294967040 }
  0x25   :  { %259 = dma.done.wait [#allocation6], 512  }
  0x26   :  { %260 = vsyncadd [#allocation6], 4294966784  ;;  %vm56_vm0 = vcmask 261120   ;;  %v45_v0 = vld [vmem:[#allocation5] sm:$0xff]  ;;  %v46_v1 = vld [vmem:[#allocation5 + $0x8] sm:$0xff]  ;;  %s267_s11 = smov [#allocation7]  }
  0x27   :  { %v47_v2 = vld [vmem:[#allocation5 + $0x10] sm:$0xff]  ;;  %v178_v3 = vpack.c.bf16 %v46_v1, %v45_v0  ;;  %v48_v4 = vld [vmem:[#allocation5 + $0x18] sm:$0xff]  ;;  %s145_s12 = sshll.u32 %s267_s11, 4  ;;  %s146_s12 = int_to_ptr.vmem [resolvable:$true] %s145_s12 }
  0x28   :  { %v43_v5 = vld [vmem:[#allocation2] sm:$0xff]  ;;  %v182_v6 = vpack.c.bf16 %v48_v4, %v47_v2  ;;  %v44_v7 = vld [vmem:[#allocation2 + $0x8] sm:$0xff]  ;;  %s235_s13 = scalar_lea.vmem %s146_s12, 256  ;;  %p240_p3 = scmp.lt.s32.totalorder %s146_s12, %s146_s12 }
  0x29   :  { %175 = vmatprep.mubr.msk.f32.mxu0 %vm56_vm0, %v43_v5  ;;  %179 = vmatprep.subr.bf16.mxu0 %v178_v3  ;;  %v158_v8 = vld [vmem:[%s338_s2] ss:$0 sm:$0xff]  ;;  %p236_p2 = scmp.ne.s32.totalorder %s146_s12, %s235_s13  ;;  %p241_p4 = scmp.lt.s32.totalorder %s235_s13, %s235_s13 }
  0x2a   :  { %181 = vmatpush3.bf16.msra.mxu0 %v178_v3 }
  0x2b   :  { %183 = vmatprep.subr.bf16.mxu0 %v182_v6  ;;  %p242_p5 = por %p241_p4, %p240_p3 }
  0x2d   :  { %p243_p6 = pnand %p242_p5, %p236_p2 }
  0x2e   :  { %185 = vmatpush3.bf16.msra.mxu0 %v182_v6 }
  0x31   :  { %176 = vmatmul.mubr.msk.f32.vlgmr.msra.gmra.mrb[0].mxu0 %vm56_vm0, %v44_v7 }
 0x104   :  { %v177_v9 = vpop.f32.mrb[0].mxu0 }
 0x105   :  { %v135_v10 = vadd.f32 %v177_v9, %v158_v8  ;;  %v129_v11 = vpop.f32.mrb[1].mxu0 }
 0x106   :  { %v130_v12 = vadd.f32 %v158_v8, %v129_v11 }
 0x107   :  { %139 = vst [vmem:[#allocation7 + $0x8] sm:$0xff] %v135_v10 }
 0x108   :  { %138 = vst [vmem:[#allocation7] sm:$0xff] %v130_v12 }
 0x109   :  { %246 = shalt.err (!%p243_p6)
}
 0x10a   :  { %s247_s2 = scalar_lea.hbm %s339_s3, 256 }
 0x10b   :  { %p248_p7 = scmp.ne.s32.totalorder %s339_s3, %s247_s2  ;;  %p251_p8 = scmp.lt.u32.totalorder %s247_s2, %s339_s3 }
 0x10d   :  { %p253_p9 = pnand %p251_p8, %p248_p7 }
 0x10f   :  { %256 = shalt.err (!%p253_p9)
}
 0x110   :  { %151 = dma.vmem_to_hbm [thread:$0]  %s146_s12, 256, %s339_s3, [#allocation4], %s264_s22, %s264_s22, %s265_s23  }
 0x111   :  { %261 = dma.done.wait [#allocation4], 256  }
 0x112   :  { %262 = vsyncadd [#allocation4], 4294967040 }
 0x113   :  { %155 = vsyncpa [#allocation3], 1 }
 0x114   :  { %156 = vsyncpa [#allocation6], 1 }
 0x115   :  { %157 = vsyncpa [#allocation4], 1 }

</bundles_post_ra>
